<compile_context>
chip_gen: v7x
topology: tpu7x:2x2x1
jax: 0.10.0
libtpu: 0.0.40
codegen_flags: <defaults>
</compile_context>

<pallas_src>
import functools

import jax
import jax.numpy as jnp
from jax.experimental import pallas as pl
from jax.experimental.pallas import tpu as pltpu


# ----------------------------------------------------------------------------
# Pallas kernel
# ----------------------------------------------------------------------------
def _make_basic_block_kernel(H, W, Cin, Cout, proj):
    HW = H * W

    def kernel(*refs):
        if proj:
            (xp_ref, xc_ref, w1_ref, s1_ref, b1_ref, w2_ref, s2_ref, b2_ref,
             ws_ref, ss_ref, bs_ref, o_ref) = refs
        else:
            (xp_ref, xc_ref, w1_ref, s1_ref, b1_ref, w2_ref, s2_ref, b2_ref,
             o_ref) = refs

        # ---- conv1 (3x3, stride=1, pad=1) + BN1 + ReLU ----------------------
        # xp_ref: (3*Cin, (H+2)*W) bf16, kw taps pre-packed on the channel
        # (sublane) axis, h pre-padded -> each kh tap is a static lane slice.
        xp = xp_ref[...]
        acc1 = jnp.zeros((Cout, HW), jnp.float32)
        for kh in range(3):
            acc1 = acc1 + jnp.dot(w1_ref[kh], xp[:, kh * W:kh * W + HW],
                                  preferred_element_type=jnp.float32)
        out1 = jnp.maximum(acc1 * s1_ref[...] + b1_ref[...], 0.0)  # (Cout,HW) f32

        # ---- conv2 (3x3, stride=1, pad=1) + BN2 -----------------------------
        # kw-pack out1 in-kernel: 3 w-shifted copies stacked on the (f32 tile
        # aligned) sublane axis -> contraction depth 3*Cout, 3 matmuls.
        w_idx = jax.lax.broadcasted_iota(jnp.int32, (1, HW), 1) % W
        zcol = jnp.zeros((Cout, 1), jnp.float32)
        padw = jnp.concatenate([zcol, out1, zcol], axis=1)          # (Cout, HW+2)
        left = jnp.where(w_idx == 0, 0.0, padw[:, 0:HW])            # out1[h, w-1]
        right = jnp.where(w_idx == W - 1, 0.0, padw[:, 2:2 + HW])   # out1[h, w+1]
        packed = jnp.concatenate([left, out1, right], axis=0)       # (3*Cout, HW)
        packed = packed.astype(jnp.bfloat16)
        zrow = jnp.zeros((3 * Cout, W), jnp.bfloat16)
        padh = jnp.concatenate([zrow, packed, zrow], axis=1)        # (3*Cout,(H+2)*W)
        acc2 = jnp.zeros((Cout, HW), jnp.float32)
        for kh in range(3):
            acc2 = acc2 + jnp.dot(w2_ref[kh], padh[:, kh * W:kh * W + HW],
                                  preferred_element_type=jnp.float32)
        out2 = acc2 * s2_ref[...] + b2_ref[...]

        # ---- shortcut -------------------------------------------------------
        if proj:  # 1x1 projection conv + BN
            sc = jnp.dot(ws_ref[...], xc_ref[...],
                         preferred_element_type=jnp.float32)
            sc = sc * ss_ref[...] + bs_ref[...]
        else:     # identity (requires Cin == Cout)
            sc = xc_ref[...].astype(jnp.float32)

        o_ref[...] = jnp.maximum(out2 + sc, 0.0).astype(o_ref.dtype)

    return kernel


# ----------------------------------------------------------------------------
# Wrapper (layout conversion, tap packing, BN folding, weight packing)
# ----------------------------------------------------------------------------
def _fold_bn(gamma, beta, mean, var, eps=1e-5):
    scale = gamma / jnp.sqrt(var + eps)
    bias = beta - mean * scale
    return (scale.reshape(-1, 1).astype(jnp.float32),
            bias.reshape(-1, 1).astype(jnp.float32))


def _pack_conv3x3(w):
    # torch (Cout, Cin, 3, 3) -> (kh, Cout, kw*Cin + cin), bf16
    cout, cin = w.shape[0], w.shape[1]
    return jnp.transpose(w, (2, 0, 3, 1)).reshape(3, cout, 3 * cin) \
              .astype(jnp.bfloat16)


@functools.partial(jax.jit, static_argnames=("stride",))
def basic_block_forward(x_nchw, params, stride=1):
    assert stride == 1, "TODO(synk): stride > 1 not implemented in-kernel"
    N, Cin, H, W = x_nchw.shape
    Cout = params["w1"].shape[0]
    proj = "ws" in params
    HW = H * W

    x_nchw = x_nchw.astype(jnp.float32)

    # conv1 input: pad h/w by 1, pack the 3 kw taps onto the channel axis,
    # flatten spatial -> (N, 3*Cin, (H+2)*W), bf16.
    x_pad = jnp.pad(x_nchw, ((0, 0), (0, 0), (1, 1), (1, 1)))
    xp = jnp.concatenate([x_pad[:, :, :, kw:kw + W] for kw in range(3)], axis=1)
    xp = xp.reshape(N, 3 * Cin, (H + 2) * W).astype(jnp.bfloat16)
    # shortcut input: plain (N, Cin, H*W), bf16.
    xc = x_nchw.reshape(N, Cin, HW).astype(jnp.bfloat16)

    w1 = _pack_conv3x3(params["w1"])            # (3, Cout, 3*Cin)
    w2 = _pack_conv3x3(params["w2"])            # (3, Cout, 3*Cout)
    s1, b1 = _fold_bn(*params["bn1"])           # (Cout, 1) f32
    s2, b2 = _fold_bn(*params["bn2"])

    args = [xp, xc, w1, s1, b1, w2, s2, b2]
    in_specs = [
        pl.BlockSpec((None, 3 * Cin, (H + 2) * W), lambda n: (n, 0, 0)),
        pl.BlockSpec((None, Cin, HW), lambda n: (n, 0, 0)),
        pl.BlockSpec((3, Cout, 3 * Cin), lambda n: (0, 0, 0)),
        pl.BlockSpec((Cout, 1), lambda n: (0, 0)),
        pl.BlockSpec((Cout, 1), lambda n: (0, 0)),
        pl.BlockSpec((3, Cout, 3 * Cout), lambda n: (0, 0, 0)),
        pl.BlockSpec((Cout, 1), lambda n: (0, 0)),
        pl.BlockSpec((Cout, 1), lambda n: (0, 0)),
    ]
    if proj:
        ws = params["ws"][:, :, 0, 0].astype(jnp.bfloat16)   # (Cout, Cin)
        ss, bs = _fold_bn(*params["bns"])
        args += [ws, ss, bs]
        in_specs += [
            pl.BlockSpec((Cout, Cin), lambda n: (0, 0)),
            pl.BlockSpec((Cout, 1), lambda n: (0, 0)),
            pl.BlockSpec((Cout, 1), lambda n: (0, 0)),
        ]

    kernel = _make_basic_block_kernel(H, W, Cin, Cout, proj)

    out_flat = pl.pallas_call(
        kernel,
        out_shape=jax.ShapeDtypeStruct((N, Cout, HW), jnp.float32),
        grid_spec=pltpu.PrefetchScalarGridSpec(
            num_scalar_prefetch=0,
            grid=(N,),
            in_specs=in_specs,
            out_specs=pl.BlockSpec((None, Cout, HW), lambda n: (n, 0, 0)),
        ),
        compiler_params=pltpu.CompilerParams(
            dimension_semantics=("parallel",),
            vmem_limit_bytes=32 * 1024 * 1024),
    )(*args)

    # (N, Cout, H*W) -> NCHW with a pure reshape (no transpose needed).
    return out_flat.reshape(N, Cout, H, W)


# ----------------------------------------------------------------------------
# Pure-JAX reference (numerical sanity check)
# ----------------------------------------------------------------------------
def _bn_ref(x, gamma, beta, mean, var, eps=1e-5):
    inv = gamma / jnp.sqrt(var + eps)
    return (x - mean[None, :, None, None]) * inv[None, :, None, None] \
        + beta[None, :, None, None]


def ref_forward(x, params, stride=1):
    def conv(x, w, s, pad):
        return jax.lax.conv_general_dilated(
            x, w, (s, s), pad, dimension_numbers=("NCHW", "OIHW", "NCHW"))

    out = jax.nn.relu(_bn_ref(conv(x, params["w1"], stride, ((1, 1), (1, 1))),
                              *params["bn1"]))
    out = _bn_ref(conv(out, params["w2"], 1, ((1, 1), (1, 1))), *params["bn2"])
    if "ws" in params:
        sc = _bn_ref(conv(x, params["ws"], stride, ((0, 0), (0, 0))),
                     *params["bns"])
    else:
        sc = x
    return jax.nn.relu(out + sc)


# ----------------------------------------------------------------------------
# Main
# ----------------------------------------------------------------------------
if __name__ == "__main__":
    N, in_planes, planes, H, W = 2, 4, 8, 16, 16
    stride = 1  # module default

    key = jax.random.PRNGKey(0)
    ks = jax.random.split(key, 12)

    def bn_params(k, c):
        k1, k2, k3, k4 = jax.random.split(k, 4)
        gamma = 1.0 + 0.1 * jax.random.normal(k1, (c,), jnp.float32)
        beta = 0.1 * jax.random.normal(k2, (c,), jnp.float32)
        mean = 0.1 * jax.random.normal(k3, (c,), jnp.float32)
        var = 1.0 + 0.1 * jax.random.uniform(k4, (c,), jnp.float32)
        return (gamma, beta, mean, var)

    params = {
        "w1": 0.1 * jax.random.normal(ks[0], (planes, in_planes, 3, 3),
                                      jnp.float32),
        "bn1": bn_params(ks[1], planes),
        "w2": 0.1 * jax.random.normal(ks[2], (planes, planes, 3, 3),
                                      jnp.float32),
        "bn2": bn_params(ks[3], planes),
    }
    if stride != 1 or in_planes != planes:
        params["ws"] = 0.1 * jax.random.normal(
            ks[4], (planes, in_planes, 1, 1), jnp.float32)
        params["bns"] = bn_params(ks[5], planes)

    x = jax.random.normal(ks[6], (N, in_planes, H, W), jnp.float32)

    out = basic_block_forward(x, params, stride=stride)
    out = jax.block_until_ready(out)

    ref = jax.block_until_ready(ref_forward(x, params, stride=stride))
    assert out.shape == ref.shape == (N, planes, H, W)
    # bf16 MXU operands (per perf guidance) vs f32 reference: tolerance sized
    # for bf16 rounding through two depth-36/72 contractions on O(1) values.
    err = float(jnp.max(jnp.abs(out - ref)))
    assert err < 4e-2, f"max abs error too large: {err}"

    print("KERNEL_OK")
</pallas_src>

<mosaic_0001>
module attributes {stable_mosaic.version = 11 : i64} {
  func.func @kernel(%arg0: i32, %arg1: memref<1x12x288xbf16, #tpu.memory_space<vmem>>, %arg2: memref<1x4x256xbf16, #tpu.memory_space<vmem>>, %arg3: memref<3x8x12xbf16, #tpu.memory_space<vmem>>, %arg4: memref<8x1xf32, #tpu.memory_space<vmem>>, %arg5: memref<8x1xf32, #tpu.memory_space<vmem>>, %arg6: memref<3x8x24xbf16, #tpu.memory_space<vmem>>, %arg7: memref<8x1xf32, #tpu.memory_space<vmem>>, %arg8: memref<8x1xf32, #tpu.memory_space<vmem>>, %arg9: memref<8x4xbf16, #tpu.memory_space<vmem>>, %arg10: memref<8x1xf32, #tpu.memory_space<vmem>>, %arg11: memref<8x1xf32, #tpu.memory_space<vmem>>, %arg12: memref<1x8x256xf32, #tpu.memory_space<vmem>>) attributes {dimension_semantics = [#tpu.dimension_semantics<parallel>], iteration_bounds = array<i64: 2>, scalar_prefetch = 0 : i64, scratch_operands = 0 : i64, tpu.core_type = #tpu.core_type<tc>, window_params = [{transform_indices = @transform_0, window_bounds = array<i64: 1, 12, 288>}, {transform_indices = @transform_1, window_bounds = array<i64: 1, 4, 256>}, {pipeline_mode = #tpu.pipeline_mode<synchronous>, transform_indices = @transform_2, window_bounds = array<i64: 3, 8, 12>}, {pipeline_mode = #tpu.pipeline_mode<synchronous>, transform_indices = @transform_3, window_bounds = array<i64: 8, 1>}, {pipeline_mode = #tpu.pipeline_mode<synchronous>, transform_indices = @transform_4, window_bounds = array<i64: 8, 1>}, {pipeline_mode = #tpu.pipeline_mode<synchronous>, transform_indices = @transform_5, window_bounds = array<i64: 3, 8, 24>}, {pipeline_mode = #tpu.pipeline_mode<synchronous>, transform_indices = @transform_6, window_bounds = array<i64: 8, 1>}, {pipeline_mode = #tpu.pipeline_mode<synchronous>, transform_indices = @transform_7, window_bounds = array<i64: 8, 1>}, {pipeline_mode = #tpu.pipeline_mode<synchronous>, transform_indices = @transform_8, window_bounds = array<i64: 8, 4>}, {pipeline_mode = #tpu.pipeline_mode<synchronous>, transform_indices = @transform_9, window_bounds = array<i64: 8, 1>}, {pipeline_mode = #tpu.pipeline_mode<synchronous>, transform_indices = @transform_10, window_bounds = array<i64: 8, 1>}, {transform_indices = @transform_11, window_bounds = array<i64: 1, 8, 256>}]} {
    %c0 = arith.constant 0 : index
    %c0_0 = arith.constant 0 : index
    %c0_1 = arith.constant 0 : index
    %0 = vector.load %arg1[%c0, %c0_0, %c0_1] : memref<1x12x288xbf16, #tpu.memory_space<vmem>>, vector<1x12x288xbf16>
    %1 = vector.shape_cast %0 : vector<1x12x288xbf16> to vector<12x288xbf16>
    %cst = arith.constant 0.000000e+00 : f32
    %2 = vector.broadcast %cst : f32 to vector<8x256xf32>
    %c0_2 = arith.constant 0 : index
    %c0_3 = arith.constant 0 : index
    %c0_4 = arith.constant 0 : index
    %3 = vector.load %arg3[%c0_2, %c0_3, %c0_4] : memref<3x8x12xbf16, #tpu.memory_space<vmem>>, vector<1x8x12xbf16>
    %4 = vector.shape_cast %3 : vector<1x8x12xbf16> to vector<8x12xbf16>
    %5 = vector.extract_strided_slice %1 {offsets = [0, 0], sizes = [12, 256], strides = [1, 1]} : vector<12x288xbf16> to vector<12x256xbf16>
    %cst_5 = arith.constant dense<0.000000e+00> : vector<8x256xf32>
    %6 = tpu.matmul %4, %5, %cst_5 {dimension_numbers = #tpu.dot_dimension_numbers<[1], [0], [0], [1], [0, 0, 1, 1], [], []>} : vector<8x12xbf16>, vector<12x256xbf16>, vector<8x256xf32> -> vector<8x256xf32>
    %7 = arith.addf %2, %6 : vector<8x256xf32>
    %c1 = arith.constant 1 : index
    %c0_6 = arith.constant 0 : index
    %c0_7 = arith.constant 0 : index
    %8 = vector.load %arg3[%c1, %c0_6, %c0_7] : memref<3x8x12xbf16, #tpu.memory_space<vmem>>, vector<1x8x12xbf16>
    %9 = vector.shape_cast %8 : vector<1x8x12xbf16> to vector<8x12xbf16>
    %10 = vector.extract_strided_slice %1 {offsets = [0, 16], sizes = [12, 256], strides = [1, 1]} : vector<12x288xbf16> to vector<12x256xbf16>
    %cst_8 = arith.constant dense<0.000000e+00> : vector<8x256xf32>
    %11 = tpu.matmul %9, %10, %cst_8 {dimension_numbers = #tpu.dot_dimension_numbers<[1], [0], [0], [1], [0, 0, 1, 1], [], []>} : vector<8x12xbf16>, vector<12x256xbf16>, vector<8x256xf32> -> vector<8x256xf32>
    %12 = arith.addf %7, %11 : vector<8x256xf32>
    %c2 = arith.constant 2 : index
    %c0_9 = arith.constant 0 : index
    %c0_10 = arith.constant 0 : index
    %13 = vector.load %arg3[%c2, %c0_9, %c0_10] : memref<3x8x12xbf16, #tpu.memory_space<vmem>>, vector<1x8x12xbf16>
    %14 = vector.shape_cast %13 : vector<1x8x12xbf16> to vector<8x12xbf16>
    %15 = vector.extract_strided_slice %1 {offsets = [0, 32], sizes = [12, 256], strides = [1, 1]} : vector<12x288xbf16> to vector<12x256xbf16>
    %cst_11 = arith.constant dense<0.000000e+00> : vector<8x256xf32>
    %16 = tpu.matmul %14, %15, %cst_11 {dimension_numbers = #tpu.dot_dimension_numbers<[1], [0], [0], [1], [0, 0, 1, 1], [], []>} : vector<8x12xbf16>, vector<12x256xbf16>, vector<8x256xf32> -> vector<8x256xf32>
    %17 = arith.addf %12, %16 : vector<8x256xf32>
    %c0_12 = arith.constant 0 : index
    %c0_13 = arith.constant 0 : index
    %18 = vector.load %arg4[%c0_12, %c0_13] : memref<8x1xf32, #tpu.memory_space<vmem>>, vector<8x1xf32>
    %19 = vector.broadcast %18 : vector<8x1xf32> to vector<8x256xf32>
    %20 = arith.mulf %17, %19 : vector<8x256xf32>
    %c0_14 = arith.constant 0 : index
    %c0_15 = arith.constant 0 : index
    %21 = vector.load %arg5[%c0_14, %c0_15] : memref<8x1xf32, #tpu.memory_space<vmem>>, vector<8x1xf32>
    %22 = vector.broadcast %21 : vector<8x1xf32> to vector<8x256xf32>
    %23 = arith.addf %20, %22 : vector<8x256xf32>
    %cst_16 = arith.constant 0.000000e+00 : f32
    %24 = vector.broadcast %cst_16 : f32 to vector<8x256xf32>
    %25 = arith.maximumf %23, %24 : vector<8x256xf32>
    %26 = tpu.iota {dimensions = array<i32: 1>} : vector<1x256xi32>
    %c16_i32 = arith.constant 16 : i32
    %c0_i32 = arith.constant 0 : i32
    %27 = arith.cmpi eq, %c16_i32, %c0_i32 : i32
    %c1_i32 = arith.constant 1 : i32
    %28 = arith.select %27, %c1_i32, %c16_i32 : i32
    %29 = vector.broadcast %28 : i32 to vector<1x256xi32>
    %30 = arith.remsi %26, %29 : vector<1x256xi32>
    %c0_i32_17 = arith.constant 0 : i32
    %31 = vector.broadcast %c0_i32_17 : i32 to vector<1x256xi32>
    %32 = arith.cmpi ne, %30, %31 : vector<1x256xi32>
    %c0_i32_18 = arith.constant 0 : i32
    %33 = vector.broadcast %c0_i32_18 : i32 to vector<1x256xi32>
    %34 = arith.cmpi slt, %30, %33 : vector<1x256xi32>
    %c0_i32_19 = arith.constant 0 : i32
    %35 = arith.cmpi slt, %28, %c0_i32_19 : i32
    %36 = vector.broadcast %35 : i1 to vector<1x256xi1>
    %37 = vector.broadcast %36 : vector<1x256xi1> to vector<1x256xi1>
    %38 = arith.xori %34, %37 : vector<1x256xi1>
    %39 = arith.andi %38, %32 : vector<1x256xi1>
    %40 = vector.broadcast %28 : i32 to vector<1x256xi32>
    %41 = arith.addi %30, %40 : vector<1x256xi32>
    %42 = arith.select %39, %41, %30 : vector<1x256xi1>, vector<1x256xi32>
    %cst_20 = arith.constant 0.000000e+00 : f32
    %43 = vector.broadcast %cst_20 : f32 to vector<8x1xf32>
    %44 = tpu.concatenate %43, %25, %43 in 1 : vector<8x1xf32>, vector<8x256xf32>, vector<8x1xf32> -> vector<8x258xf32>
    %c0_i32_21 = arith.constant 0 : i32
    %45 = vector.broadcast %c0_i32_21 : i32 to vector<1x256xi32>
    %46 = arith.cmpi eq, %42, %45 : vector<1x256xi32>
    %47 = vector.extract_strided_slice %44 {offsets = [0, 0], sizes = [8, 256], strides = [1, 1]} : vector<8x258xf32> to vector<8x256xf32>
    %cst_22 = arith.constant 0.000000e+00 : f32
    %48 = vector.shape_cast %46 : vector<1x256xi1> to vector<1x256xi1>
    %49 = vector.broadcast %48 : vector<1x256xi1> to vector<8x256xi1>
    %50 = vector.broadcast %cst_22 : f32 to vector<8x256xf32>
    %51 = arith.select %49, %50, %47 : vector<8x256xi1>, vector<8x256xf32>
    %c15_i32 = arith.constant 15 : i32
    %52 = vector.broadcast %c15_i32 : i32 to vector<1x256xi32>
    %53 = arith.cmpi eq, %42, %52 : vector<1x256xi32>
    %54 = vector.extract_strided_slice %44 {offsets = [0, 2], sizes = [8, 256], strides = [1, 1]} : vector<8x258xf32> to vector<8x256xf32>
    %cst_23 = arith.constant 0.000000e+00 : f32
    %55 = vector.shape_cast %53 : vector<1x256xi1> to vector<1x256xi1>
    %56 = vector.broadcast %55 : vector<1x256xi1> to vector<8x256xi1>
    %57 = vector.broadcast %cst_23 : f32 to vector<8x256xf32>
    %58 = arith.select %56, %57, %54 : vector<8x256xi1>, vector<8x256xf32>
    %59 = tpu.concatenate %51, %25, %58 in 0 : vector<8x256xf32>, vector<8x256xf32>, vector<8x256xf32> -> vector<24x256xf32>
    %60 = arith.truncf %59 : vector<24x256xf32> to vector<24x256xbf16>
    %cst_24 = arith.constant 0.000000e+00 : bf16
    %61 = vector.broadcast %cst_24 : bf16 to vector<24x16xbf16>
    %62 = tpu.concatenate %61, %60, %61 in 1 : vector<24x16xbf16>, vector<24x256xbf16>, vector<24x16xbf16> -> vector<24x288xbf16>
    %cst_25 = arith.constant 0.000000e+00 : f32
    %63 = vector.broadcast %cst_25 : f32 to vector<8x256xf32>
    %c0_26 = arith.constant 0 : index
    %c0_27 = arith.constant 0 : index
    %c0_28 = arith.constant 0 : index
    %64 = vector.load %arg6[%c0_26, %c0_27, %c0_28] : memref<3x8x24xbf16, #tpu.memory_space<vmem>>, vector<1x8x24xbf16>
    %65 = vector.shape_cast %64 : vector<1x8x24xbf16> to vector<8x24xbf16>
    %66 = vector.extract_strided_slice %62 {offsets = [0, 0], sizes = [24, 256], strides = [1, 1]} : vector<24x288xbf16> to vector<24x256xbf16>
    %cst_29 = arith.constant dense<0.000000e+00> : vector<8x256xf32>
    %67 = tpu.matmul %65, %66, %cst_29 {dimension_numbers = #tpu.dot_dimension_numbers<[1], [0], [0], [1], [0, 0, 1, 1], [], []>} : vector<8x24xbf16>, vector<24x256xbf16>, vector<8x256xf32> -> vector<8x256xf32>
    %68 = arith.addf %63, %67 : vector<8x256xf32>
    %c1_30 = arith.constant 1 : index
    %c0_31 = arith.constant 0 : index
    %c0_32 = arith.constant 0 : index
    %69 = vector.load %arg6[%c1_30, %c0_31, %c0_32] : memref<3x8x24xbf16, #tpu.memory_space<vmem>>, vector<1x8x24xbf16>
    %70 = vector.shape_cast %69 : vector<1x8x24xbf16> to vector<8x24xbf16>
    %71 = vector.extract_strided_slice %62 {offsets = [0, 16], sizes = [24, 256], strides = [1, 1]} : vector<24x288xbf16> to vector<24x256xbf16>
    %cst_33 = arith.constant dense<0.000000e+00> : vector<8x256xf32>
    %72 = tpu.matmul %70, %71, %cst_33 {dimension_numbers = #tpu.dot_dimension_numbers<[1], [0], [0], [1], [0, 0, 1, 1], [], []>} : vector<8x24xbf16>, vector<24x256xbf16>, vector<8x256xf32> -> vector<8x256xf32>
    %73 = arith.addf %68, %72 : vector<8x256xf32>
    %c2_34 = arith.constant 2 : index
    %c0_35 = arith.constant 0 : index
    %c0_36 = arith.constant 0 : index
    %74 = vector.load %arg6[%c2_34, %c0_35, %c0_36] : memref<3x8x24xbf16, #tpu.memory_space<vmem>>, vector<1x8x24xbf16>
    %75 = vector.shape_cast %74 : vector<1x8x24xbf16> to vector<8x24xbf16>
    %76 = vector.extract_strided_slice %62 {offsets = [0, 32], sizes = [24, 256], strides = [1, 1]} : vector<24x288xbf16> to vector<24x256xbf16>
    %cst_37 = arith.constant dense<0.000000e+00> : vector<8x256xf32>
    %77 = tpu.matmul %75, %76, %cst_37 {dimension_numbers = #tpu.dot_dimension_numbers<[1], [0], [0], [1], [0, 0, 1, 1], [], []>} : vector<8x24xbf16>, vector<24x256xbf16>, vector<8x256xf32> -> vector<8x256xf32>
    %78 = arith.addf %73, %77 : vector<8x256xf32>
    %c0_38 = arith.constant 0 : index
    %c0_39 = arith.constant 0 : index
    %79 = vector.load %arg7[%c0_38, %c0_39] : memref<8x1xf32, #tpu.memory_space<vmem>>, vector<8x1xf32>
    %80 = vector.broadcast %79 : vector<8x1xf32> to vector<8x256xf32>
    %81 = arith.mulf %78, %80 : vector<8x256xf32>
    %c0_40 = arith.constant 0 : index
    %c0_41 = arith.constant 0 : index
    %82 = vector.load %arg8[%c0_40, %c0_41] : memref<8x1xf32, #tpu.memory_space<vmem>>, vector<8x1xf32>
    %83 = vector.broadcast %82 : vector<8x1xf32> to vector<8x256xf32>
    %84 = arith.addf %81, %83 : vector<8x256xf32>
    %c0_42 = arith.constant 0 : index
    %c0_43 = arith.constant 0 : index
    %85 = vector.load %arg9[%c0_42, %c0_43] : memref<8x4xbf16, #tpu.memory_space<vmem>>, vector<8x4xbf16>
    %c0_44 = arith.constant 0 : index
    %c0_45 = arith.constant 0 : index
    %c0_46 = arith.constant 0 : index
    %86 = vector.load %arg2[%c0_44, %c0_45, %c0_46] : memref<1x4x256xbf16, #tpu.memory_space<vmem>>, vector<1x4x256xbf16>
    %87 = vector.shape_cast %86 : vector<1x4x256xbf16> to vector<4x256xbf16>
    %cst_47 = arith.constant dense<0.000000e+00> : vector<8x256xf32>
    %88 = tpu.matmul %85, %87, %cst_47 {dimension_numbers = #tpu.dot_dimension_numbers<[1], [0], [0], [1], [0, 0, 1, 1], [], []>} : vector<8x4xbf16>, vector<4x256xbf16>, vector<8x256xf32> -> vector<8x256xf32>
    %c0_48 = arith.constant 0 : index
    %c0_49 = arith.constant 0 : index
    %89 = vector.load %arg10[%c0_48, %c0_49] : memref<8x1xf32, #tpu.memory_space<vmem>>, vector<8x1xf32>
    %90 = vector.broadcast %89 : vector<8x1xf32> to vector<8x256xf32>
    %91 = arith.mulf %88, %90 : vector<8x256xf32>
    %c0_50 = arith.constant 0 : index
    %c0_51 = arith.constant 0 : index
    %92 = vector.load %arg11[%c0_50, %c0_51] : memref<8x1xf32, #tpu.memory_space<vmem>>, vector<8x1xf32>
    %93 = vector.broadcast %92 : vector<8x1xf32> to vector<8x256xf32>
    %94 = arith.addf %91, %93 : vector<8x256xf32>
    %95 = arith.addf %84, %94 : vector<8x256xf32>
    %cst_52 = arith.constant 0.000000e+00 : f32
    %96 = vector.broadcast %cst_52 : f32 to vector<8x256xf32>
    %97 = arith.maximumf %95, %96 : vector<8x256xf32>
    %c0_53 = arith.constant 0 : index
    %c0_54 = arith.constant 0 : index
    %c0_55 = arith.constant 0 : index
    %98 = vector.load %arg12[%c0_53, %c0_54, %c0_55] : memref<1x8x256xf32, #tpu.memory_space<vmem>>, vector<1x8x256xf32>
    %99 = vector.shape_cast %98 : vector<1x8x256xf32> to vector<8x256xf32>
    %100 = vector.shape_cast %97 : vector<8x256xf32> to vector<1x8x256xf32>
    tpu.vector_store %arg12[%c0_53, %c0_54, %c0_55], %100 {strides = array<i32>} : memref<1x8x256xf32, #tpu.memory_space<vmem>>, vector<1x8x256xf32>,
    return
  }
  func.func @transform_0(%arg0: i32) -> (i32, i32, i32) {
    %c0_i32 = arith.constant 0 : i32
    %c0_i32_0 = arith.constant 0 : i32
    %c0_i32_1 = arith.constant 0 : i32
    return %arg0, %c0_i32, %c0_i32_0 : i32, i32, i32
  }
  func.func @transform_1(%arg0: i32) -> (i32, i32, i32) {
    %c0_i32 = arith.constant 0 : i32
    %c0_i32_0 = arith.constant 0 : i32
    %c0_i32_1 = arith.constant 0 : i32
    return %arg0, %c0_i32, %c0_i32_0 : i32, i32, i32
  }
  func.func @transform_2(%arg0: i32) -> (i32, i32, i32) {
    %c0_i32 = arith.constant 0 : i32
    %c0_i32_0 = arith.constant 0 : i32
    %c0_i32_1 = arith.constant 0 : i32
    %c0_i32_2 = arith.constant 0 : i32
    return %c0_i32, %c0_i32_0, %c0_i32_1 : i32, i32, i32
  }
  func.func @transform_3(%arg0: i32) -> (i32, i32) {
    %c0_i32 = arith.constant 0 : i32
    %c0_i32_0 = arith.constant 0 : i32
    %c0_i32_1 = arith.constant 0 : i32
    return %c0_i32, %c0_i32_0 : i32, i32
  }
  func.func @transform_4(%arg0: i32) -> (i32, i32) {
    %c0_i32 = arith.constant 0 : i32
    %c0_i32_0 = arith.constant 0 : i32
    %c0_i32_1 = arith.constant 0 : i32
    return %c0_i32, %c0_i32_0 : i32, i32
  }
  func.func @transform_5(%arg0: i32) -> (i32, i32, i32) {
    %c0_i32 = arith.constant 0 : i32
    %c0_i32_0 = arith.constant 0 : i32
    %c0_i32_1 = arith.constant 0 : i32
    %c0_i32_2 = arith.constant 0 : i32
    return %c0_i32, %c0_i32_0, %c0_i32_1 : i32, i32, i32
  }
  func.func @transform_6(%arg0: i32) -> (i32, i32) {
    %c0_i32 = arith.constant 0 : i32
    %c0_i32_0 = arith.constant 0 : i32
    %c0_i32_1 = arith.constant 0 : i32
    return %c0_i32, %c0_i32_0 : i32, i32
  }
  func.func @transform_7(%arg0: i32) -> (i32, i32) {
    %c0_i32 = arith.constant 0 : i32
    %c0_i32_0 = arith.constant 0 : i32
    %c0_i32_1 = arith.constant 0 : i32
    return %c0_i32, %c0_i32_0 : i32, i32
  }
  func.func @transform_8(%arg0: i32) -> (i32, i32) {
    %c0_i32 = arith.constant 0 : i32
    %c0_i32_0 = arith.constant 0 : i32
    %c0_i32_1 = arith.constant 0 : i32
    return %c0_i32, %c0_i32_0 : i32, i32
  }
  func.func @transform_9(%arg0: i32) -> (i32, i32) {
    %c0_i32 = arith.constant 0 : i32
    %c0_i32_0 = arith.constant 0 : i32
    %c0_i32_1 = arith.constant 0 : i32
    return %c0_i32, %c0_i32_0 : i32, i32
  }
  func.func @transform_10(%arg0: i32) -> (i32, i32) {
    %c0_i32 = arith.constant 0 : i32
    %c0_i32_0 = arith.constant 0 : i32
    %c0_i32_1 = arith.constant 0 : i32
    return %c0_i32, %c0_i32_0 : i32, i32
  }
  func.func @transform_11(%arg0: i32) -> (i32, i32, i32) {
    %c0_i32 = arith.constant 0 : i32
    %c0_i32_0 = arith.constant 0 : i32
    %c0_i32_1 = arith.constant 0 : i32
    return %arg0, %c0_i32, %c0_i32_0 : i32, i32, i32
  }
}

</mosaic_0001>

<bundles_post_ra>
// kernel: basic_block_forward.1
= control target key start
LH: loop header
LB: loop body
LE: loop exit
PB: predicated region body
PF: predicated region fallthrough
CT: control target
= control target key end

     0   :  { %s1245_s17 = smov 0   ;;  %s1373_s0 = inlined_call_operand.vmem [shape: bf16[2,12,288], index: 0, kind: input, shape index: {}]   ;;  %s1374_s1 = inlined_call_operand.vmem [shape: bf16[2,4,256], index: 1, kind: input, shape index: {}]   ;;  %s1375_s2 = inlined_call_operand.vmem [shape: bf16[3,8,12], index: 2, kind: input, shape index: {}]   ;;  %s1376_s3 = inlined_call_operand.vmem [shape: f32[8,1], index: 3, kind: input, shape index: {}]   ;;  %s1377_s4 = inlined_call_operand.vmem [shape: f32[8,1], index: 4, kind: input, shape index: {}]   ;;  %s1378_s5 = inlined_call_operand.vmem [shape: bf16[3,8,24], index: 5, kind: input, shape index: {}]   ;;  %s1379_s6 = inlined_call_operand.vmem [shape: f32[8,1], index: 6, kind: input, shape index: {}]   ;;  %s1380_s7 = inlined_call_operand.vmem [shape: f32[8,1], index: 7, kind: input, shape index: {}]   ;;  %s1381_s8 = inlined_call_operand.vmem [shape: bf16[8,4], index: 8, kind: input, shape index: {}]   ;;  %s1382_s9 = inlined_call_operand.vmem [shape: f32[8,1], index: 9, kind: input, shape index: {}]   ;;  %s1383_s10 = inlined_call_operand.vmem [shape: f32[8,1], index: 10, kind: input, shape index: {}]   ;;  %s1384_s11 = inlined_call_operand.vmem [shape: f32[2,8,256], index: 11, kind: output, shape index: {}]  }
   0x1 LB: > { %s1086_s18 = sadd.s32 4294967295, %s1177_s17   ;;  %p1090_p0 = scmp.ge.s32.totalorder %s1177_s17, 1  ;;  %s1177_s17 = sphi %s1245_s17, %s21_s17  }
   0x2   : > { %p347_p1 = scmp.lt.s32.totalorder %s1177_s17, 3 }
   0x4   : > { %p348_p2 = pnand %p1090_p0, %p347_p1 }
   0x5   : > { %p392_p3 = scmp.lt.s32.totalorder (!%p348_p2), %s1086_s18, 1  ;;  %v1179_v0 = vmov (!%p348_p2), 0   ;;  %s1180_s23 = smov (!%p348_p2), 112   ;;  %v602_v4 = vld [vmem:[%s1376_s3] sm:$0xff] (!%p348_p2)  ;;  %vm434_vm0 = vcmask (!%p348_p2), 916480   ;;  %vm441_vm1 = vcmask (!%p348_p2), 1045504   ;;  %v620_v35 = vlaneseq (!%p348_p2) }
   0x6   : > { %351 = sbr.rel (%p348_p2) target bundleno = 1114 (0x45a), region = 64  ;;  %480 = vmatprep.mubr.bf16.mxu0 (!%p348_p2), %v1179_v0  ;;  %1155 = vset.pattern.permute.xlu0 (!%p348_p2), %v1179_v0  ;;  %s1181_s24 = smov (!%p348_p2), 96   ;;  %v610_v5 = vld [vmem:[%s1377_s4] sm:$0xff] (!%p348_p2)  ;;  %vm437_vm2 = vcmask (!%p348_p2), 97280   ;;  %vm547_vm3 = vcmask (!%p348_p2), 785408   ;;  %vm653_vm4 = vcmask (!%p348_p2), 7168  }
   0x7   : > { %1156 = vset.pattern.permute.xlu1 (!%p348_p2), %v1179_v0  ;;  %788 = vmatprep.mubr.bf16.mxu1 (!%p348_p2), %v1179_v0  ;;  %v1096_v13 = vld [vmem:[%s1375_s2 + $0x4] sm:$0xf] (!%p348_p2)  ;;  %v412_v19 = vld [vmem:[%s1375_s2] sm:$0xf] (!%p348_p2)  ;;  %v1104_v21 = vld [vmem:[%s1375_s2 + $0x8] sm:$0xf] (!%p348_p2) }
   0x8   : > { %s1182_s16 = smov (!%p348_p2), 1   ;;  %v621_v36 = vand.u32 (!%p348_p2), 127, %v620_v35  ;;  %vm949_vm7 = vcmask (!%p348_p2), 1041408   ;;  %s1184_s21 = smov (!%p348_p2), 16   ;;  %v934_v54 = vld [vmem:[%s1381_s8] sm:$0xf] (!%p348_p2) }
   0x9   : > { %vm945_vm8 = vcmask (!%p348_p2), 31744   ;;  %vm682_vm9 = vcmask (!%p348_p2), 1031168   ;;  %vm705_vm12 = vcmask (!%p348_p2), 130048   ;;  %vm749_vm13 = vcmask (!%p348_p2), 1043456  }
   0xa   : > { %v622_v37 = vadd.s32 (!%p348_p2), 128, %v621_v36  ;;  %v627_v39 = vand.u32 (!%p348_p2), 15, %v621_v36  ;;  %vm745_vm14 = vcmask (!%p348_p2), 195584   ;;  %vm1110_vm15 = vmneg (!%p348_p2), %vm705_vm12 }
   0xc   : > { %v634_v38 = vand.u32 (!%p348_p2), 15, %v622_v37  ;;  %vm660_vm6 = vcmp.eq.s32.totalorder (!%p348_p2), %v627_v39, 0  ;;  %vm668_vm10 = vcmp.eq.s32.totalorder (!%p348_p2), %v627_v39, 15 }
   0xd   : > { %s1386_s18 = smov (!%p392_p3, %s1086_s18), 1 }
   0xe   : > { %s1140_s19 = smul.u32 24, %s1386_s18  ;;  %vm661_vm5 = vcmp.eq.s32.totalorder %v634_v38, 0  ;;  %s1122_s20 = sshll.u32 %s1386_s18, 2  ;;  %vm669_vm11 = vcmp.eq.s32.totalorder %v634_v38, 15  ;;  %v720_v38 = vld [vmem:[%s1378_s5] sm:$0xf] }
   0xf   : > { %s401_s26 = scalar_lea.vmem %s1374_s1, %s1122_s20 }
  0x10   : > { %s396_s22 = scalar_lea.vmem %s1373_s0, %s1140_s19  ;;  %s1183_s19 = smov 126   ;;  %v1117_v51 = vld.sshfl [vmem:[%s401_s26] sm:$0x33 pattern:$0x76325410] }
  0x11   : > { %v1167_v1 = vld [vmem:[%s396_s22] ss:$12 sps:$4 sm:$0x3f]   ;;  %v1169_v2 = vld [vmem:[%s396_s22 + $0x8] ss:$12 sps:$4 sm:$0x3f]   ;;  %v944_v52 = vcombine.high %v1117_v51, %v1117_v51 }
  0x12   : > { %428 = vrot.lane.b32.xlu0 %v1167_v1, %s1180_s23  ;;  %v1170_v3 = vld [vmem:[%s396_s22 + $0x4] ss:$12 sps:$4 sm:$0x3f]   ;;  %432 = vrot.lane.b32.xlu1 %v1169_v2, %s1180_s23  ;;  %v493_v14 = vsel %vm441_vm1, %v1167_v1, 0  ;;  %v951_v53 = vsel %vm949_vm7, %v1117_v51, 0  ;;  %s1123_s26 = sshll.u32 %s1386_s18, 4 }
  0x13   : > { %s406_s29 = scalar_lea.vmem %s1384_s11, %s1123_s26 }
  0x16   : > { %430 = vrot.lane.b32.xlu0 %v1170_v3, %s1180_s23  ;;  %541 = vrot.lane.b32.xlu1 %v1167_v1, %s1181_s24 }
  0x1a   : > { %543 = vrot.lane.b32.xlu0 %v1170_v3, %s1181_s24  ;;  %545 = vrot.lane.b32.xlu1 %v1169_v2, %s1181_s24 }
  0x1e   : > { %605 = vperm.xlu0 %1155, %v602_v4   ;;  %613 = vperm.xlu1 %1156, %v610_v5  }
  0x84   : > { %v429_v6 = vpop.permute.xlu0 %428  ;;  %v433_v7 = vpop.permute.xlu1 %432 }
  0x88   : > { %v431_v8 = vpop.permute.xlu0 %430  ;;  %v542_v12 = vpop.permute.xlu1 %541 }
  0x89   : > { %v436_v9 = vsel %vm434_vm0, %v431_v8, %v433_v7  ;;  %v435_v10 = vsel %vm434_vm0, %v429_v6, %v431_v8 }
  0x8a   : > { %1100 = vmatprep.subr.msk.bf16.mxu0 %vm441_vm1, %v436_v9  ;;  %v443_v11 = vsel %vm441_vm1, %v435_v10, 0 }
  0x8b   : > { %449 = vmatpush1.bf16.msra.mxu0 %v443_v11 }
  0x8c   : > { %1102 = vmatprep.subr.msk.bf16.mxu0 %vm441_vm1, %v1170_v3  ;;  %v544_v15 = vpop.permute.xlu0 %543  ;;  %v546_v16 = vpop.permute.xlu1 %545 }
  0x8d   : > { %v549_v17 = vsel %vm547_vm3, %v544_v15, %v546_v16  ;;  %v548_v18 = vsel %vm547_vm3, %v542_v12, %v544_v15 }
  0x8e   : > { %1101 = vmatmul.mubr.msk.bf16.vlgmr.msra.gmra.mrb[0].mxu0 %vm437_vm2, %v1096_v13  ;;  %v554_v20 = vsel %vm441_vm1, %v548_v18, 0 }
  0x8f   : > { %499 = vmatpush1.bf16.msra.mxu0 %v493_v14  ;;  %530 = vmatprep.mubr.bf16.mxu0 %v1179_v0 }
  0x90   : > { %1105 = vmatprep.subr.msk.bf16.mxu0 %vm441_vm1, %v549_v17  ;;  %v918_v17 = vld [vmem:[%s1379_s6] sm:$0xff] }
  0x9a   : > { %1103 = vmatmul.mubr.msk.bf16.vlgmr.msra.gmra.mrb[0].mxu0 %vm437_vm2, %v412_v19  ;;  %v997_v19 = vld [vmem:[%s1382_s9] sm:$0xff] }
  0x9b   : > { %560 = vmatpush1.bf16.msra.mxu0 %v554_v20  ;;  %591 = vmatprep.mubr.bf16.mxu0 %v1179_v0  ;;  %v926_v20 = vld [vmem:[%s1380_s7] sm:$0xff] }
  0x9c   : > { %1118 = vmatprep.subr.msk.bf16.mxu0 %vm949_vm7, %v944_v52 }
  0x9d   : > { %v606_v22 = vpop.permute.xlu0 %605  ;;  %v614_v24 = vpop.permute.xlu1 %613 }
  0xa6   : > { %1106 = vmatmul.mubr.msk.bf16.vlgmr.msra.gmra.mrb[0].mxu0 %vm437_vm2, %v1104_v21 }
  0xa7   : > { %988 = vmatprep.mubr.bf16.mxu0 %v1179_v0  ;;  %957 = vmatpush1.bf16.msra.mxu0 %v951_v53 }
  0xae   : > { %1119 = vmatmul.mubr.msk.bf16.vlgmr.msra.gmra.mrb[4].mxu0 %vm945_vm8, %v934_v54 }
 0x179   : > { %v593_v23 = vpop.f32.mrb[0].mxu0 }
 0x17a   : > { %v608_v25 = vmul.f32 %v606_v22, %v593_v23  ;;  %v595_v26 = vpop.f32.mrb[1].mxu0 }
 0x17b   : > { %v609_v27 = vmul.f32 %v606_v22, %v595_v26  ;;  %v597_v28 = vpop.f32.mrb[2].mxu0  ;;  %v1005_v22 = vld [vmem:[%s1383_s10] sm:$0xff] }
 0x17c   : > { %v616_v29 = vadd.f32 %v614_v24, %v608_v25  ;;  %v598_v30 = vpop.f32.mrb[3].mxu0 }
 0x17d   : > { %v617_v31 = vadd.f32 %v614_v24, %v609_v27 }
 0x17e   : > { %v618_v32 = vmax.f32 %v616_v29, 0.0 }
 0x17f   : > { %v619_v33 = vmax.f32 %v617_v31, 0.0  ;;  %v1107_v31 = vld [vmem:[%s1378_s5 + $0x4] sm:$0xf] }
 0x181   : > { %v1157_v34 = vpack.i.bf16 %v619_v33, %v618_v32  ;;  %v990_v18 = vpop.f32.mrb[4].mxu0 }
 0x182   : > { %v992_v21 = vpop.f32.mrb[5].mxu0 }
 0x183   : > { %1158 = vrot.lane.b32.xlu1 %v1157_v34, %s1182_s16  ;;  %v994_v23 = vpop.f32.mrb[6].mxu0 }
 0x184   : > { %v995_v24 = vpop.f32.mrb[7].mxu0 }
 0x1f5   : > { %v1159_v40 = vpop.permute.xlu1 %1158 }
 0x1f6   : > { %v1161_v41 = vunpack.i.h.bf16 %v1159_v40  ;;  %v1160_v42 = vunpack.i.l.bf16 %v1159_v40 }
 0x1f8   : > { %v658_v43 = vsel %vm653_vm4, 0.0, %v1160_v42  ;;  %v659_v44 = vsel %vm653_vm4, %v1161_v41, 0.0  ;;  %v654_v45 = vsel %vm653_vm4, %v1160_v42, %v1161_v41 }
 0x1f9   : > { %680 = vrot.lane.b32.xlu1 %v659_v44, %s1183_s19  ;;  %v1162_v46 = vpack.i.bf16 %v654_v45, %v658_v43  ;;  %v667_v47 = vsel %vm661_vm5, 0.0, %v654_v45  ;;  %v666_v48 = vsel %vm660_vm6, 0.0, %v658_v43  ;;  %v1114_v45 = vld [vmem:[%s1378_s5 + $0x8] sm:$0xf] }
 0x1fa   : > { %v690_v49 = vpack.c.bf16 %v619_v33, %v667_v47  ;;  %v689_v50 = vpack.c.bf16 %v618_v32, %v666_v48 }
 0x1fb   : > { %1163 = vrot.lane.b32.xlu0 %v1162_v46, %s1183_s19 }
 0x1fd   : > { %699 = vrot.lane.b32.xlu1 %v690_v49, %s1184_s21 }
 0x1ff   : > { %697 = vrot.lane.b32.xlu0 %v689_v50, %s1184_s21 }
 0x26b   : > { %v681_v56 = vpop.permute.xlu1 %680 }
 0x26d   : > { %v1164_v55 = vpop.permute.xlu0 %1163 }
 0x26e   : > { %v1166_v57 = vunpack.i.h.bf16 %v1164_v55  ;;  %v1165_v58 = vunpack.i.l.bf16 %v1164_v55 }
 0x26f   : > { %v700_v2 = vpop.permute.xlu1 %699 }
 0x270   : > { %v683_v59 = vsel %vm682_vm9, %v1165_v58, %v1166_v57  ;;  %v684_v60 = vsel %vm682_vm9, %v1166_v57, %v681_v56  ;;  %v717_v5 = vsel %vm705_vm12, %v700_v2, 0 }
 0x271   : > { %v687_v61 = vsel %vm668_vm10, 0.0, %v683_v59  ;;  %v688_v62 = vsel %vm669_vm11, 0.0, %v684_v60  ;;  %v698_v3 = vpop.permute.xlu0 %697 }
 0x272   : > { %v691_v63 = vpack.c.bf16 %v687_v61, %v687_v61  ;;  %v692_v1 = vpack.c.bf16 %v688_v62, %v688_v62  ;;  %v712_v4 = vsel %vm705_vm12, 0, %v698_v3  ;;  %v706_v6 = vsel %vm705_vm12, %v698_v3, %v700_v2 }
 0x274   : > { %701 = vrot.lane.b32.xlu0 %v691_v63, %s1184_s21  ;;  %703 = vrot.lane.b32.xlu1 %v692_v1, %s1184_s21 }
 0x278   : > { %727 = vrot.lane.b32.xlu0 %v712_v4, %s1180_s23  ;;  %731 = vrot.lane.b32.xlu1 %v717_v5, %s1180_s23 }
 0x27c   : > { %729 = vrot.lane.b32.xlu0 %v706_v6, %s1180_s23 }
 0x2e6   : > { %v702_v7 = vpop.permute.xlu0 %701  ;;  %v704_v8 = vpop.permute.xlu1 %703 }
 0x2e7   : > { %v715_v9 = vsel %vm705_vm12, 0, %v702_v7  ;;  %v707_v10 = vsel %vm705_vm12, %v702_v7, %v704_v8  ;;  %v719_v12 = vsel %vm705_vm12, %v704_v8, 0 }
 0x2e8   : > { %733 = vrot.lane.b32.xlu1 %v715_v9, %s1180_s23  ;;  %735 = vrot.lane.b32.xlu0 %v707_v10, %s1180_s23  ;;  %v800_v36 = vsel %vm749_vm13, %v715_v9, 0 }
 0x2ea   : > { %v728_v11 = vpop.permute.xlu0 %727  ;;  %v732_v13 = vpop.permute.xlu1 %731 }
 0x2ec   : > { %737 = vrot.lane.b32.xlu1 %v719_v12, %s1180_s23  ;;  %850 = vrot.lane.b32.xlu0 %v706_v6, %s1181_s24 }
 0x2ee   : > { %v730_v14 = vpop.permute.xlu0 %729 }
 0x2ef   : > { %v740_v15 = vsel %vm434_vm0, %v730_v14, %v732_v13  ;;  %v739_v16 = vsel %vm434_vm0, %v728_v11, %v730_v14 }
 0x2f0   : > { %852 = vrot.lane.b32.xlu1 %v717_v5, %s1181_s24  ;;  %848 = vrot.lane.b32.xlu0 %v712_v4, %s1181_s24 }
 0x2f1   : > { %756 = vmatprep.subr.bf16.mxu1 %v740_v15 }
 0x2f2   : > { %757 = vmatpush1.bf16.msra.mxu1 %v739_v16 }
 0x2f4   : > { %854 = vrot.lane.b32.xlu1 %v715_v9, %s1181_s24  ;;  %856 = vrot.lane.b32.xlu0 %v707_v10, %s1181_s24 }
 0x2f8   : > { %858 = vrot.lane.b32.xlu1 %v719_v12, %s1181_s24  ;;  %921 = vperm.xlu0 %1155, %v918_v17  }
 0x2fc   : > { %1000 = vperm.xlu1 %1156, %v997_v19   ;;  %929 = vperm.xlu0 %1155, %v926_v20  }
 0x300   : > { %1008 = vperm.xlu1 %1156, %v1005_v22  }
 0x35a   : > { %v736_v25 = vpop.permute.xlu0 %735  ;;  %v734_v26 = vpop.permute.xlu1 %733 }
 0x35b   : > { %v741_v27 = vsel %vm434_vm0, %v734_v26, %v736_v25 }
 0x35c   : > { %v751_v30 = vsel %vm749_vm13, %v741_v27, 0 }
 0x35e   : > { %v738_v28 = vpop.permute.xlu1 %737  ;;  %v851_v32 = vpop.permute.xlu0 %850 }
 0x35f   : > { %v742_v29 = vsel %vm434_vm0, %v736_v25, %v738_v28 }
 0x360   : > { %1108 = vmatprep.subr.msk.bf16.mxu1 %vm749_vm13, %v742_v29 }
 0x361   : > { %759 = vmatpush1.bf16.msra.mxu1 %v751_v30 }
 0x362   : > { %805 = vmatprep.subr.bf16.mxu1 %v706_v6  ;;  %v853_v33 = vpop.permute.xlu1 %852  ;;  %v849_v34 = vpop.permute.xlu0 %848 }
 0x363   : > { %v861_v37 = vsel %vm547_vm3, %v851_v32, %v853_v33  ;;  %v860_v41 = vsel %vm547_vm3, %v849_v34, %v851_v32 }
 0x364   : > { %1109 = vmatmul.mubr.msk.bf16.vlgmr.msra.gmra.mrb[0].mxu1 %vm745_vm14, %v1107_v31 }
 0x365   : > { %1111 = vmatpush1.bf16.msk.msra.mxu1 %vm1110_vm15, %v698_v3  ;;  %837 = vmatprep.mubr.bf16.mxu1 %v1179_v0 }
 0x366   : > { %1112 = vmatprep.subr.msk.bf16.mxu1 %vm749_vm13, %v707_v10  ;;  %v855_v35 = vpop.permute.xlu1 %854  ;;  %v857_v39 = vpop.permute.xlu0 %856 }
 0x367   : > { %v862_v42 = vsel %vm547_vm3, %v855_v35, %v857_v39 }
 0x368   : > { %v870_v44 = vsel %vm749_vm13, %v862_v42, 0 }
 0x369   : > { %808 = vmatpush1.bf16.msra.mxu1 %v800_v36 }
 0x36a   : > { %875 = vmatprep.subr.bf16.mxu1 %v861_v37  ;;  %v859_v40 = vpop.permute.xlu1 %858 }
 0x36b   : > { %v863_v43 = vsel %vm547_vm3, %v857_v39, %v859_v40 }
 0x370   : > { %1113 = vmatmul.mubr.msk.bf16.vlgmr.msra.gmra.mrb[0].mxu1 %vm745_vm14, %v720_v38 }
 0x371   : > { %876 = vmatpush1.bf16.msra.mxu1 %v860_v41  ;;  %907 = vmatprep.mubr.bf16.mxu1 %v1179_v0 }
 0x372   : > { %1115 = vmatprep.subr.msk.bf16.mxu1 %vm749_vm13, %v863_v43 }
 0x375   : > { %878 = vmatpush1.bf16.msra.mxu1 %v870_v44 }
 0x377   : > { %v922_v47 = vpop.permute.xlu0 %921 }
 0x37b   : > { %v1001_v46 = vpop.permute.xlu1 %1000  ;;  %v930_v0 = vpop.permute.xlu0 %929 }
 0x37c   : > { %1116 = vmatmul.mubr.msk.bf16.vlgmr.msra.gmra.mrb[0].mxu1 %vm745_vm14, %v1114_v45  ;;  %v1003_v50 = vmul.f32 %v1001_v46, %v990_v18  ;;  %v1004_v53 = vmul.f32 %v1001_v46, %v992_v21 }
 0x37f   : > { %v1009_v48 = vpop.permute.xlu1 %1008 }
 0x380   : > { %v1011_v56 = vadd.f32 %v1009_v48, %v1003_v50  ;;  %v1012_v59 = vadd.f32 %v1009_v48, %v1004_v53 }
 0x44f   : > { %v909_v49 = vpop.f32.mrb[0].mxu1 }
 0x450   : > { %v924_v51 = vmul.f32 %v922_v47, %v909_v49  ;;  %v911_v52 = vpop.f32.mrb[1].mxu1 }
 0x451   : > { %v925_v54 = vmul.f32 %v922_v47, %v911_v52  ;;  %v913_v55 = vpop.f32.mrb[2].mxu1 }
 0x452   : > { %v932_v57 = vadd.f32 %v930_v0, %v924_v51  ;;  %v914_v58 = vpop.f32.mrb[3].mxu1 }
 0x453   : > { %v933_v60 = vadd.f32 %v930_v0, %v925_v54 }
 0x454   : > { %v1013_v61 = vadd.f32 %v1011_v56, %v932_v57 }
 0x455   : > { %v1014_v62 = vadd.f32 %v1012_v59, %v933_v60 }
 0x456   : > { %v1015_v63 = vmax.f32 %v1013_v61, 0.0 }
 0x457   : > { %v1016_v1 = vmax.f32 %v1014_v62, 0.0 }
 0x458   : > { %1017 = vst [vmem:[%s406_s29] sm:$0xff] %v1015_v63 }
 0x459   : > { %1018 = vst [vmem:[%s406_s29 + $0x8] sm:$0xff] %v1016_v1 }
 0x45a PF: > { %s21_s17 = sadd.s32 1, %s1177_s17  }
 0x45b   : > { %p18_p4 = scmp.ge.s32.totalorder %s21_s17, 4  }
 0x45d   :  { %20 = sbr.rel (!%p18_p4) target bundleno = 1 (0x1), region = 101 }

</bundles_post_ra>
